<compile_context>
chip_gen: v6e
topology: v6e:2x2x1
jax: 0.10.0
libtpu: 0.0.40
codegen_flags: <defaults>
</compile_context>

<pallas_src>
import functools

import jax
import jax.numpy as jnp
from jax.experimental import pallas as pl
from jax.experimental.pallas import tpu as pltpu


def _round_up(v, m):
    return (v + m - 1) // m * m


def _elu(h):
    # ELU(alpha=1): x if x > 0 else exp(x) - 1  (clamp exp arg for safety)
    return jnp.where(h > 0.0, h, jnp.exp(jnp.minimum(h, 0.0)) - 1.0)


def dragonet_kernel(x_ref,
                    w1_ref, b1_ref, w2_ref, b2_ref, w3_ref, b3_ref,
                    w4_ref, b4_ref,
                    wh1_ref, bh1_ref, wh2_ref, bh2_ref,
                    bb_ref, yall_ref):
    """One batch tile: backbone MLP + fused per-treatment heads."""
    dot = functools.partial(jnp.dot, preferred_element_type=jnp.float32)

    x = x_ref[...]                                           # (TB, F)
    # backbone: Linear -> ELU -> Linear -> ELU -> Linear -> ELU -> Linear
    h = _elu(dot(x, w1_ref[...]) + b1_ref[...])              # (TB, H)
    h = _elu(dot(h, w2_ref[...]) + b2_ref[...])
    h = _elu(dot(h, w3_ref[...]) + b3_ref[...])
    h = dot(h, w4_ref[...]) + b4_ref[...]                    # (TB, H), no final ELU
    bb_ref[...] = h

    # fused heads: (TB,H)@(H,T*h2) -> (TB,T*h2), then block-diagonal second
    # layer (T*h2, TP) -> lane-dense (TB, TP) output (cols >= T are zero+0bias)
    z = dot(h, wh1_ref[...]) + bh1_ref[...]                  # (TB, T*h2)
    yall_ref[...] = dot(z, wh2_ref[...]) + bh2_ref[...]      # (TB, TP)


def init_params(key, input_size, hidden_size, num_treatment):
    h2 = hidden_size // 2
    ks = jax.random.split(key, 12)
    nrm = lambda k, s: (0.1 * jax.random.normal(k, s)).astype(jnp.float32)
    return dict(
        # backbone weights stored as [in, out]; biases as [1, out]
        w1=nrm(ks[0], (input_size, hidden_size)),  b1=nrm(ks[1], (1, hidden_size)),
        w2=nrm(ks[2], (hidden_size, hidden_size)), b2=nrm(ks[3], (1, hidden_size)),
        w3=nrm(ks[4], (hidden_size, hidden_size)), b3=nrm(ks[5], (1, hidden_size)),
        w4=nrm(ks[6], (hidden_size, hidden_size)), b4=nrm(ks[7], (1, hidden_size)),
        # per-treatment heads (kept in the PyTorch-like layout; packed in wrapper)
        wh1=nrm(ks[8], (num_treatment, hidden_size, h2)),
        bh1=nrm(ks[9], (num_treatment, 1, h2)),
        wh2=nrm(ks[10], (num_treatment, h2, 1)),
        bh2=nrm(ks[11], (num_treatment, 1, 1)),
    )


def _pack_heads(wh1, bh1, wh2, bh2):
    """Pack T heads into one (H, T*h2) matmul + block-diagonal (T*h2, TP) matmul."""
    T, H, h2 = wh1.shape
    TH2 = T * h2
    TP = _round_up(T, 128)                       # lane-dense head output width
    wh1p = jnp.transpose(wh1, (1, 0, 2)).reshape(H, TH2)   # [:, t*h2+j] = wh1[t,:,j]
    bh1p = bh1.reshape(1, TH2)
    w2flat = wh2.reshape(T, h2)                  # squeeze trailing 1
    sel = jnp.eye(T, TP, dtype=wh2.dtype)        # (T, TP), one-hot column per head
    w2bd = (w2flat[:, :, None] * sel[:, None, :]).reshape(TH2, TP)
    bh2row = jnp.zeros((1, TP), wh2.dtype).at[0, :T].set(bh2.reshape(T))
    return wh1p, bh1p, w2bd, bh2row, TP


def dragonet_forward(x, a, params, test=False, batch_tile=512):
    x = x.astype(jnp.float32)
    B, F = x.shape
    H = params["w4"].shape[1]
    T = params["wh1"].shape[0]

    wh1p, bh1p, w2bd, bh2row, TP = _pack_heads(
        params["wh1"], params["bh1"], params["wh2"], params["bh2"])
    TH2 = wh1p.shape[1]

    # batch tiling (sublane multiple of 8); pad B up to a whole number of tiles
    TB = min(batch_tile, _round_up(B, 8))
    B_pad = _round_up(B, TB)
    if B_pad != B:
        x = jnp.pad(x, ((0, B_pad - B), (0, 0)))
    n_tiles = B_pad // TB

    tile = lambda i: (i, 0)     # batch-tiled arrays
    full = lambda i: (0, 0)     # weights: same block every step -> VMEM resident

    in_specs = [
        pl.BlockSpec((TB, F), tile),                                   # x
        pl.BlockSpec((F, H), full), pl.BlockSpec((1, H), full),        # w1, b1
        pl.BlockSpec((H, H), full), pl.BlockSpec((1, H), full),        # w2, b2
        pl.BlockSpec((H, H), full), pl.BlockSpec((1, H), full),        # w3, b3
        pl.BlockSpec((H, H), full), pl.BlockSpec((1, H), full),        # w4, b4
        pl.BlockSpec((H, TH2), full), pl.BlockSpec((1, TH2), full),    # wh1p, bh1p
        pl.BlockSpec((TH2, TP), full), pl.BlockSpec((1, TP), full),    # w2bd, bh2row
    ]
    out_specs = (pl.BlockSpec((TB, H), tile),
                 pl.BlockSpec((TB, TP), tile))

    # VMEM budget: weights (single-buffered, resident) + double-buffered
    # batch-tiled x / outputs + compute headroom; cap below v7x's 64 MiB.
    f32 = 4
    weight_bytes = (F * H + 3 * H * H + H * TH2 + TH2 * TP + 4 * H + TH2 + TP) * f32
    tile_bytes = 2 * (TB * F + TB * H + TB * TP) * f32
    vmem_limit = min(56 * 1024 * 1024,
                     max(16 * 1024 * 1024, 2 * (weight_bytes + tile_bytes)))

    bb, yall_pad = pl.pallas_call(
        dragonet_kernel,
        out_shape=(jax.ShapeDtypeStruct((B_pad, H), jnp.float32),
                   jax.ShapeDtypeStruct((B_pad, TP), jnp.float32)),
        grid=(n_tiles,),
        in_specs=in_specs,
        out_specs=out_specs,
        compiler_params=pltpu.CompilerParams(
            dimension_semantics=("parallel",),        # megacore on v7x
            vmem_limit_bytes=int(vmem_limit)),
    )(x, params["w1"], params["b1"], params["w2"], params["b2"],
      params["w3"], params["b3"], params["w4"], params["b4"],
      wh1p, bh1p, w2bd, bh2row)

    bb = bb[:B]
    yall = yall_pad[:B, :T]                                   # (B, T)
    a_idx = a.reshape(B, 1).astype(jnp.int32)
    ysel = jnp.take_along_axis(yall, a_idx, axis=1)           # (B, 1)

    if test:
        # matches PyTorch test=True: (backbone_out, selected y, y_pred_all (B,T,1))
        return bb, ysel, yall[..., None]
    return bb, ysel


def dragonet_reference(x, a, params):
    """Pure-JAX high-precision reference mirroring the PyTorch forward."""
    hp = functools.partial(jnp.dot, precision=jax.lax.Precision.HIGHEST,
                           preferred_element_type=jnp.float32)
    elu = lambda h: jnp.where(h > 0.0, h, jnp.exp(jnp.minimum(h, 0.0)) - 1.0)
    h = elu(hp(x, params["w1"]) + params["b1"])
    h = elu(hp(h, params["w2"]) + params["b2"])
    h = elu(hp(h, params["w3"]) + params["b3"])
    h = hp(h, params["w4"]) + params["b4"]
    ys = []
    for k in range(params["wh1"].shape[0]):
        z = hp(h, params["wh1"][k]) + params["bh1"][k]
        ys.append(hp(z, params["wh2"][k]) + params["bh2"][k])   # (B, 1)
    y_all = jnp.stack(ys, axis=1)                               # (B, T, 1)
    sel = y_all[jnp.arange(x.shape[0]), a.reshape(-1).astype(jnp.int32)]  # (B, 1)
    return h, sel, y_all


if __name__ == "__main__":
    B, F, H, T = 16, 16, 128, 2

    key = jax.random.PRNGKey(0)
    k_param, k_x, k_a = jax.random.split(key, 3)

    params = init_params(k_param, F, H, T)
    x = jax.random.normal(k_x, (B, F), dtype=jnp.float32)
    a = jax.random.randint(k_a, (B,), 0, T, dtype=jnp.int32)

    bb, ysel, yall = dragonet_forward(x, a, params, test=True)
    jax.block_until_ready((bb, ysel, yall))

    bb_ref, ysel_ref, yall_ref = dragonet_reference(x, a, params)

    assert bb.shape == (B, H) and ysel.shape == (B, 1) and yall.shape == (B, T, 1)
    # kernel uses default (single-pass bf16, f32-accumulate) MXU precision, so
    # compare to the HIGHEST-precision reference with a loosened tolerance.
    assert jnp.allclose(bb, bb_ref, atol=5e-2, rtol=5e-2)
    assert jnp.allclose(ysel, ysel_ref, atol=5e-2, rtol=5e-2)
    assert jnp.allclose(yall, yall_ref, atol=5e-2, rtol=5e-2)

    print("KERNEL_OK")
</pallas_src>

<mosaic_0001>
module attributes {stable_mosaic.version = 11 : i64} {
  func.func @dragonet_kernel(%arg0: i32, %arg1: memref<16x16xf32, #tpu.memory_space<vmem>>, %arg2: memref<16x128xf32, #tpu.memory_space<vmem>>, %arg3: memref<1x128xf32, #tpu.memory_space<vmem>>, %arg4: memref<128x128xf32, #tpu.memory_space<vmem>>, %arg5: memref<1x128xf32, #tpu.memory_space<vmem>>, %arg6: memref<128x128xf32, #tpu.memory_space<vmem>>, %arg7: memref<1x128xf32, #tpu.memory_space<vmem>>, %arg8: memref<128x128xf32, #tpu.memory_space<vmem>>, %arg9: memref<1x128xf32, #tpu.memory_space<vmem>>, %arg10: memref<128x128xf32, #tpu.memory_space<vmem>>, %arg11: memref<1x128xf32, #tpu.memory_space<vmem>>, %arg12: memref<128x128xf32, #tpu.memory_space<vmem>>, %arg13: memref<1x128xf32, #tpu.memory_space<vmem>>, %arg14: memref<16x128xf32, #tpu.memory_space<vmem>>, %arg15: memref<16x128xf32, #tpu.memory_space<vmem>>) attributes {dimension_semantics = [#tpu.dimension_semantics<parallel>], iteration_bounds = array<i64: 1>, scalar_prefetch = 0 : i64, scratch_operands = 0 : i64, tpu.core_type = #tpu.core_type<tc>, window_params = [{transform_indices = @transform_0, window_bounds = array<i64: 16, 16>}, {pipeline_mode = #tpu.pipeline_mode<synchronous>, transform_indices = @transform_1, window_bounds = array<i64: 16, 128>}, {pipeline_mode = #tpu.pipeline_mode<synchronous>, transform_indices = @transform_2, window_bounds = array<i64: 1, 128>}, {pipeline_mode = #tpu.pipeline_mode<synchronous>, transform_indices = @transform_3, window_bounds = array<i64: 128, 128>}, {pipeline_mode = #tpu.pipeline_mode<synchronous>, transform_indices = @transform_4, window_bounds = array<i64: 1, 128>}, {pipeline_mode = #tpu.pipeline_mode<synchronous>, transform_indices = @transform_5, window_bounds = array<i64: 128, 128>}, {pipeline_mode = #tpu.pipeline_mode<synchronous>, transform_indices = @transform_6, window_bounds = array<i64: 1, 128>}, {pipeline_mode = #tpu.pipeline_mode<synchronous>, transform_indices = @transform_7, window_bounds = array<i64: 128, 128>}, {pipeline_mode = #tpu.pipeline_mode<synchronous>, transform_indices = @transform_8, window_bounds = array<i64: 1, 128>}, {pipeline_mode = #tpu.pipeline_mode<synchronous>, transform_indices = @transform_9, window_bounds = array<i64: 128, 128>}, {pipeline_mode = #tpu.pipeline_mode<synchronous>, transform_indices = @transform_10, window_bounds = array<i64: 1, 128>}, {pipeline_mode = #tpu.pipeline_mode<synchronous>, transform_indices = @transform_11, window_bounds = array<i64: 128, 128>}, {pipeline_mode = #tpu.pipeline_mode<synchronous>, transform_indices = @transform_12, window_bounds = array<i64: 1, 128>}, {transform_indices = @transform_13, window_bounds = array<i64: 16, 128>}, {transform_indices = @transform_14, window_bounds = array<i64: 16, 128>}]} {
    %c0 = arith.constant 0 : index
    %c0_0 = arith.constant 0 : index
    %0 = vector.load %arg1[%c0, %c0_0] : memref<16x16xf32, #tpu.memory_space<vmem>>, vector<16x16xf32>
    %c0_1 = arith.constant 0 : index
    %c0_2 = arith.constant 0 : index
    %1 = vector.load %arg2[%c0_1, %c0_2] : memref<16x128xf32, #tpu.memory_space<vmem>>, vector<16x128xf32>
    %cst = arith.constant dense<0.000000e+00> : vector<16x128xf32>
    %2 = tpu.matmul %0, %1, %cst {dimension_numbers = #tpu.dot_dimension_numbers<[1], [0], [0], [1], [0, 0, 1, 1], [], []>} : vector<16x16xf32>, vector<16x128xf32>, vector<16x128xf32> -> vector<16x128xf32>
    %c0_3 = arith.constant 0 : index
    %c0_4 = arith.constant 0 : index
    %3 = vector.load %arg3[%c0_3, %c0_4] : memref<1x128xf32, #tpu.memory_space<vmem>>, vector<1x128xf32>
    %4 = vector.broadcast %3 : vector<1x128xf32> to vector<16x128xf32>
    %5 = arith.addf %2, %4 : vector<16x128xf32>
    %cst_5 = arith.constant 0.000000e+00 : f32
    %6 = vector.broadcast %cst_5 : f32 to vector<16x128xf32>
    %7 = arith.cmpf ogt, %5, %6 : vector<16x128xf32>
    %cst_6 = arith.constant 0.000000e+00 : f32
    %8 = vector.broadcast %cst_6 : f32 to vector<16x128xf32>
    %9 = arith.minimumf %5, %8 : vector<16x128xf32>
    %10 = math.exp %9 : vector<16x128xf32>
    %cst_7 = arith.constant 1.000000e+00 : f32
    %11 = vector.broadcast %cst_7 : f32 to vector<16x128xf32>
    %12 = arith.subf %10, %11 : vector<16x128xf32>
    %13 = arith.select %7, %5, %12 : vector<16x128xi1>, vector<16x128xf32>
    %c0_8 = arith.constant 0 : index
    %c0_9 = arith.constant 0 : index
    %14 = vector.load %arg4[%c0_8, %c0_9] : memref<128x128xf32, #tpu.memory_space<vmem>>, vector<128x128xf32>
    %cst_10 = arith.constant dense<0.000000e+00> : vector<16x128xf32>
    %15 = tpu.matmul %13, %14, %cst_10 {dimension_numbers = #tpu.dot_dimension_numbers<[1], [0], [0], [1], [0, 0, 1, 1], [], []>} : vector<16x128xf32>, vector<128x128xf32>, vector<16x128xf32> -> vector<16x128xf32>
    %c0_11 = arith.constant 0 : index
    %c0_12 = arith.constant 0 : index
    %16 = vector.load %arg5[%c0_11, %c0_12] : memref<1x128xf32, #tpu.memory_space<vmem>>, vector<1x128xf32>
    %17 = vector.broadcast %16 : vector<1x128xf32> to vector<16x128xf32>
    %18 = arith.addf %15, %17 : vector<16x128xf32>
    %cst_13 = arith.constant 0.000000e+00 : f32
    %19 = vector.broadcast %cst_13 : f32 to vector<16x128xf32>
    %20 = arith.cmpf ogt, %18, %19 : vector<16x128xf32>
    %cst_14 = arith.constant 0.000000e+00 : f32
    %21 = vector.broadcast %cst_14 : f32 to vector<16x128xf32>
    %22 = arith.minimumf %18, %21 : vector<16x128xf32>
    %23 = math.exp %22 : vector<16x128xf32>
    %cst_15 = arith.constant 1.000000e+00 : f32
    %24 = vector.broadcast %cst_15 : f32 to vector<16x128xf32>
    %25 = arith.subf %23, %24 : vector<16x128xf32>
    %26 = arith.select %20, %18, %25 : vector<16x128xi1>, vector<16x128xf32>
    %c0_16 = arith.constant 0 : index
    %c0_17 = arith.constant 0 : index
    %27 = vector.load %arg6[%c0_16, %c0_17] : memref<128x128xf32, #tpu.memory_space<vmem>>, vector<128x128xf32>
    %cst_18 = arith.constant dense<0.000000e+00> : vector<16x128xf32>
    %28 = tpu.matmul %26, %27, %cst_18 {dimension_numbers = #tpu.dot_dimension_numbers<[1], [0], [0], [1], [0, 0, 1, 1], [], []>} : vector<16x128xf32>, vector<128x128xf32>, vector<16x128xf32> -> vector<16x128xf32>
    %c0_19 = arith.constant 0 : index
    %c0_20 = arith.constant 0 : index
    %29 = vector.load %arg7[%c0_19, %c0_20] : memref<1x128xf32, #tpu.memory_space<vmem>>, vector<1x128xf32>
    %30 = vector.broadcast %29 : vector<1x128xf32> to vector<16x128xf32>
    %31 = arith.addf %28, %30 : vector<16x128xf32>
    %cst_21 = arith.constant 0.000000e+00 : f32
    %32 = vector.broadcast %cst_21 : f32 to vector<16x128xf32>
    %33 = arith.cmpf ogt, %31, %32 : vector<16x128xf32>
    %cst_22 = arith.constant 0.000000e+00 : f32
    %34 = vector.broadcast %cst_22 : f32 to vector<16x128xf32>
    %35 = arith.minimumf %31, %34 : vector<16x128xf32>
    %36 = math.exp %35 : vector<16x128xf32>
    %cst_23 = arith.constant 1.000000e+00 : f32
    %37 = vector.broadcast %cst_23 : f32 to vector<16x128xf32>
    %38 = arith.subf %36, %37 : vector<16x128xf32>
    %39 = arith.select %33, %31, %38 : vector<16x128xi1>, vector<16x128xf32>
    %c0_24 = arith.constant 0 : index
    %c0_25 = arith.constant 0 : index
    %40 = vector.load %arg8[%c0_24, %c0_25] : memref<128x128xf32, #tpu.memory_space<vmem>>, vector<128x128xf32>
    %cst_26 = arith.constant dense<0.000000e+00> : vector<16x128xf32>
    %41 = tpu.matmul %39, %40, %cst_26 {dimension_numbers = #tpu.dot_dimension_numbers<[1], [0], [0], [1], [0, 0, 1, 1], [], []>} : vector<16x128xf32>, vector<128x128xf32>, vector<16x128xf32> -> vector<16x128xf32>
    %c0_27 = arith.constant 0 : index
    %c0_28 = arith.constant 0 : index
    %42 = vector.load %arg9[%c0_27, %c0_28] : memref<1x128xf32, #tpu.memory_space<vmem>>, vector<1x128xf32>
    %43 = vector.broadcast %42 : vector<1x128xf32> to vector<16x128xf32>
    %44 = arith.addf %41, %43 : vector<16x128xf32>
    %c0_29 = arith.constant 0 : index
    %c0_30 = arith.constant 0 : index
    %45 = vector.load %arg14[%c0_29, %c0_30] : memref<16x128xf32, #tpu.memory_space<vmem>>, vector<16x128xf32>
    tpu.vector_store %arg14[%c0_29, %c0_30], %44 {strides = array<i32>} : memref<16x128xf32, #tpu.memory_space<vmem>>, vector<16x128xf32>,
    %c0_31 = arith.constant 0 : index
    %c0_32 = arith.constant 0 : index
    %46 = vector.load %arg10[%c0_31, %c0_32] : memref<128x128xf32, #tpu.memory_space<vmem>>, vector<128x128xf32>
    %cst_33 = arith.constant dense<0.000000e+00> : vector<16x128xf32>
    %47 = tpu.matmul %44, %46, %cst_33 {dimension_numbers = #tpu.dot_dimension_numbers<[1], [0], [0], [1], [0, 0, 1, 1], [], []>} : vector<16x128xf32>, vector<128x128xf32>, vector<16x128xf32> -> vector<16x128xf32>
    %c0_34 = arith.constant 0 : index
    %c0_35 = arith.constant 0 : index
    %48 = vector.load %arg11[%c0_34, %c0_35] : memref<1x128xf32, #tpu.memory_space<vmem>>, vector<1x128xf32>
    %49 = vector.broadcast %48 : vector<1x128xf32> to vector<16x128xf32>
    %50 = arith.addf %47, %49 : vector<16x128xf32>
    %c0_36 = arith.constant 0 : index
    %c0_37 = arith.constant 0 : index
    %51 = vector.load %arg12[%c0_36, %c0_37] : memref<128x128xf32, #tpu.memory_space<vmem>>, vector<128x128xf32>
    %cst_38 = arith.constant dense<0.000000e+00> : vector<16x128xf32>
    %52 = tpu.matmul %50, %51, %cst_38 {dimension_numbers = #tpu.dot_dimension_numbers<[1], [0], [0], [1], [0, 0, 1, 1], [], []>} : vector<16x128xf32>, vector<128x128xf32>, vector<16x128xf32> -> vector<16x128xf32>
    %c0_39 = arith.constant 0 : index
    %c0_40 = arith.constant 0 : index
    %53 = vector.load %arg13[%c0_39, %c0_40] : memref<1x128xf32, #tpu.memory_space<vmem>>, vector<1x128xf32>
    %54 = vector.broadcast %53 : vector<1x128xf32> to vector<16x128xf32>
    %55 = arith.addf %52, %54 : vector<16x128xf32>
    %c0_41 = arith.constant 0 : index
    %c0_42 = arith.constant 0 : index
    %56 = vector.load %arg15[%c0_41, %c0_42] : memref<16x128xf32, #tpu.memory_space<vmem>>, vector<16x128xf32>
    tpu.vector_store %arg15[%c0_41, %c0_42], %55 {strides = array<i32>} : memref<16x128xf32, #tpu.memory_space<vmem>>, vector<16x128xf32>,
    return
  }
  func.func @transform_0(%arg0: i32) -> (i32, i32) {
    %c0_i32 = arith.constant 0 : i32
    %c0_i32_0 = arith.constant 0 : i32
    return %arg0, %c0_i32 : i32, i32
  }
  func.func @transform_1(%arg0: i32) -> (i32, i32) {
    %c0_i32 = arith.constant 0 : i32
    %c0_i32_0 = arith.constant 0 : i32
    %c0_i32_1 = arith.constant 0 : i32
    return %c0_i32, %c0_i32_0 : i32, i32
  }
  func.func @transform_2(%arg0: i32) -> (i32, i32) {
    %c0_i32 = arith.constant 0 : i32
    %c0_i32_0 = arith.constant 0 : i32
    %c0_i32_1 = arith.constant 0 : i32
    return %c0_i32, %c0_i32_0 : i32, i32
  }
  func.func @transform_3(%arg0: i32) -> (i32, i32) {
    %c0_i32 = arith.constant 0 : i32
    %c0_i32_0 = arith.constant 0 : i32
    %c0_i32_1 = arith.constant 0 : i32
    return %c0_i32, %c0_i32_0 : i32, i32
  }
  func.func @transform_4(%arg0: i32) -> (i32, i32) {
    %c0_i32 = arith.constant 0 : i32
    %c0_i32_0 = arith.constant 0 : i32
    %c0_i32_1 = arith.constant 0 : i32
    return %c0_i32, %c0_i32_0 : i32, i32
  }
  func.func @transform_5(%arg0: i32) -> (i32, i32) {
    %c0_i32 = arith.constant 0 : i32
    %c0_i32_0 = arith.constant 0 : i32
    %c0_i32_1 = arith.constant 0 : i32
    return %c0_i32, %c0_i32_0 : i32, i32
  }
  func.func @transform_6(%arg0: i32) -> (i32, i32) {
    %c0_i32 = arith.constant 0 : i32
    %c0_i32_0 = arith.constant 0 : i32
    %c0_i32_1 = arith.constant 0 : i32
    return %c0_i32, %c0_i32_0 : i32, i32
  }
  func.func @transform_7(%arg0: i32) -> (i32, i32) {
    %c0_i32 = arith.constant 0 : i32
    %c0_i32_0 = arith.constant 0 : i32
    %c0_i32_1 = arith.constant 0 : i32
    return %c0_i32, %c0_i32_0 : i32, i32
  }
  func.func @transform_8(%arg0: i32) -> (i32, i32) {
    %c0_i32 = arith.constant 0 : i32
    %c0_i32_0 = arith.constant 0 : i32
    %c0_i32_1 = arith.constant 0 : i32
    return %c0_i32, %c0_i32_0 : i32, i32
  }
  func.func @transform_9(%arg0: i32) -> (i32, i32) {
    %c0_i32 = arith.constant 0 : i32
    %c0_i32_0 = arith.constant 0 : i32
    %c0_i32_1 = arith.constant 0 : i32
    return %c0_i32, %c0_i32_0 : i32, i32
  }
  func.func @transform_10(%arg0: i32) -> (i32, i32) {
    %c0_i32 = arith.constant 0 : i32
    %c0_i32_0 = arith.constant 0 : i32
    %c0_i32_1 = arith.constant 0 : i32
    return %c0_i32, %c0_i32_0 : i32, i32
  }
  func.func @transform_11(%arg0: i32) -> (i32, i32) {
    %c0_i32 = arith.constant 0 : i32
    %c0_i32_0 = arith.constant 0 : i32
    %c0_i32_1 = arith.constant 0 : i32
    return %c0_i32, %c0_i32_0 : i32, i32
  }
  func.func @transform_12(%arg0: i32) -> (i32, i32) {
    %c0_i32 = arith.constant 0 : i32
    %c0_i32_0 = arith.constant 0 : i32
    %c0_i32_1 = arith.constant 0 : i32
    return %c0_i32, %c0_i32_0 : i32, i32
  }
  func.func @transform_13(%arg0: i32) -> (i32, i32) {
    %c0_i32 = arith.constant 0 : i32
    %c0_i32_0 = arith.constant 0 : i32
    return %arg0, %c0_i32 : i32, i32
  }
  func.func @transform_14(%arg0: i32) -> (i32, i32) {
    %c0_i32 = arith.constant 0 : i32
    %c0_i32_0 = arith.constant 0 : i32
    return %arg0, %c0_i32 : i32, i32
  }
}

</mosaic_0001>

<bundles_post_ra>
// kernel: tpu_custom_call.1
= control target key start
LH: loop header
LB: loop body
LE: loop exit
PB: predicated region body
PF: predicated region fallthrough
CT: control target
= control target key end

     0   :  { %20 = vsyncpa [#allocation3], 0  ;;  %s1467_s0 = inlined_call_operand.hbm [shape: f32[16,16], index: 0, kind: input, shape index: {}]   ;;  %s1468_s1 = inlined_call_operand.hbm [shape: f32[16,128], index: 1, kind: input, shape index: {}]   ;;  %s1469_s2 = inlined_call_operand.vmem [shape: f32[1,128], index: 2, kind: input, shape index: {}]   ;;  %s1470_s3 = inlined_call_operand.hbm [shape: f32[128,128], index: 3, kind: input, shape index: {}]   ;;  %s1471_s4 = inlined_call_operand.vmem [shape: f32[1,128], index: 4, kind: input, shape index: {}]   ;;  %s1472_s5 = inlined_call_operand.hbm [shape: f32[128,128], index: 5, kind: input, shape index: {}]   ;;  %s1473_s6 = inlined_call_operand.vmem [shape: f32[1,128], index: 6, kind: input, shape index: {}]   ;;  %s1474_s7 = inlined_call_operand.hbm [shape: f32[128,128], index: 7, kind: input, shape index: {}]   ;;  %s1475_s8 = inlined_call_operand.vmem [shape: f32[1,128], index: 8, kind: input, shape index: {}]   ;;  %s1476_s9 = inlined_call_operand.hbm [shape: f32[128,128], index: 9, kind: input, shape index: {}]   ;;  %s1477_s10 = inlined_call_operand.vmem [shape: f32[1,128], index: 10, kind: input, shape index: {}]   ;;  %s1478_s11 = inlined_call_operand.hbm [shape: f32[128,128], index: 11, kind: input, shape index: {}]   ;;  %s1479_s12 = inlined_call_operand.vmem [shape: f32[1,128], index: 12, kind: input, shape index: {}]   ;;  %s1480_s13 = inlined_call_operand.hbm [shape: f32[16,128], index: 13, kind: output, shape index: {0}]   ;;  %s1481_s14 = inlined_call_operand.hbm [shape: f32[16,128], index: 14, kind: output, shape index: {1}]  }
   0x1   :  { %21 = vsyncpa [#allocation6], 0 }
   0x2   :  { %22 = vsyncpa [#allocation9], 0 }
   0x3   :  { %23 = vsyncpa [#allocation12], 0 }
   0x4   :  { %24 = vsyncpa [#allocation4], 0 }
   0x5   :  { %25 = vsyncpa [#allocation16], 0  ;;  %s1307_s29 = smov [#allocation5]   ;;  %s1308_s15 = smov [#allocation8]  }
   0x6   :  { %s43_s30 = sshll.u32 %s1307_s29, 4  ;;  %s71_s16 = sshll.u32 %s1308_s15, 4  ;;  %s44_s30 = int_to_ptr.vmem [resolvable:$true] %s43_s30  ;;  %s72_s16 = int_to_ptr.vmem [resolvable:$true] %s71_s16 }
   0x7   :  { %s1123_s17 = scalar_lea.vmem %s44_s30, 256  ;;  %p1128_p1 = scmp.lt.s32.totalorder %s44_s30, %s44_s30 }
   0x8   :  { %p1124_p0 = scmp.ne.s32.totalorder %s44_s30, %s1123_s17  ;;  %p1129_p2 = scmp.lt.s32.totalorder %s1123_s17, %s1123_s17 }
   0xa   :  { %p1130_p3 = por %p1129_p2, %p1128_p1 }
   0xc   :  { %p1131_p4 = pnand %p1130_p3, %p1124_p0 }
   0xe   :  { %1134 = shalt.err (!%p1131_p4)
}
   0xf   :  { %s1309_s18 = smov 128   ;;  %s1310_s19 = smov 8  }
  0x10   :  { %49 = dma.hbm_to_vmem [thread:$0]  %s1468_s1, 256, %s44_s30, [#allocation6], %s1309_s18, %s1309_s18, %s1310_s19  }
  0x11   :  { %s1143_s22 = scalar_lea.vmem %s72_s16, 2048  ;;  %p1148_p6 = scmp.lt.s32.totalorder %s72_s16, %s72_s16 }
  0x12   :  { %p1144_p5 = scmp.ne.s32.totalorder %s72_s16, %s1143_s22  ;;  %p1149_p7 = scmp.lt.s32.totalorder %s1143_s22, %s1143_s22 }
  0x14   :  { %p1150_p8 = por %p1149_p7, %p1148_p6 }
  0x16   :  { %p1151_p9 = pnand %p1150_p8, %p1144_p5 }
  0x18   :  { %1154 = shalt.err (!%p1151_p9)
}
  0x19   :  { %77 = dma.hbm_to_vmem [thread:$0]  %s1472_s5, 2048, %s72_s16, [#allocation9], %s1309_s18, %s1309_s18, %s1310_s19  }
  0x1a   :  { %s1311_s25 = smov [#allocation11]   ;;  %s1312_s27 = smov [#allocation2]  }
  0x1b   :  { %s99_s26 = sshll.u32 %s1311_s25, 4  ;;  %s31_s28 = sshll.u32 %s1312_s27, 4  ;;  %s100_s26 = int_to_ptr.vmem [resolvable:$true] %s99_s26  ;;  %s32_s28 = int_to_ptr.vmem [resolvable:$true] %s31_s28 }
  0x1c   :  { %s1163_s1 = scalar_lea.vmem %s100_s26, 2048  ;;  %p1168_p11 = scmp.lt.s32.totalorder %s100_s26, %s100_s26 }
  0x1d   :  { %p1164_p10 = scmp.ne.s32.totalorder %s100_s26, %s1163_s1  ;;  %p1169_p12 = scmp.lt.s32.totalorder %s1163_s1, %s1163_s1 }
  0x1f   :  { %p1170_p13 = por %p1169_p12, %p1168_p11 }
  0x21   :  { %p1171_p0 = pnand %p1170_p13, %p1164_p10 }
  0x23   :  { %1174 = shalt.err (!%p1171_p0)
}
  0x24   :  { %105 = dma.hbm_to_vmem [thread:$0]  %s1476_s9, 2048, %s100_s26, [#allocation12], %s1309_s18, %s1309_s18, %s1310_s19  }
  0x25   :  { %s1183_s5 = scalar_lea.vmem %s32_s28, 256  ;;  %p1188_p2 = scmp.lt.s32.totalorder %s32_s28, %s32_s28 }
  0x26   :  { %p1184_p1 = scmp.ne.s32.totalorder %s32_s28, %s1183_s5  ;;  %p1189_p3 = scmp.lt.s32.totalorder %s1183_s5, %s1183_s5 }
  0x28   :  { %p1190_p4 = por %p1189_p3, %p1188_p2 }
  0x2a   :  { %p1191_p5 = pnand %p1190_p4, %p1184_p1 }
  0x2c   :  { %1194 = shalt.err (!%p1191_p5)
}
  0x2d   :  { %37 = dma.hbm_to_vmem [thread:$0]  %s1467_s0, 256, %s32_s28, [#allocation3], %s1309_s18, %s1309_s18, %s1310_s19  }
  0x2e   :  { %s1313_s17 = smov [#allocation7]   ;;  %s1314_s21 = smov [#allocation10]  }
  0x2f   :  { %s57_s20 = sshll.u32 %s1313_s17, 4  ;;  %s85_s22 = sshll.u32 %s1314_s21, 4  ;;  %s58_s20 = int_to_ptr.vmem [resolvable:$true] %s57_s20  ;;  %s86_s22 = int_to_ptr.vmem [resolvable:$true] %s85_s22 }
  0x30   :  { %s1203_s9 = scalar_lea.vmem %s58_s20, 2048  ;;  %p1208_p7 = scmp.lt.s32.totalorder %s58_s20, %s58_s20 }
  0x31   :  { %p1204_p6 = scmp.ne.s32.totalorder %s58_s20, %s1203_s9  ;;  %p1209_p8 = scmp.lt.s32.totalorder %s1203_s9, %s1203_s9 }
  0x33   :  { %p1210_p9 = por %p1209_p8, %p1208_p7 }
  0x35   :  { %p1211_p10 = pnand %p1210_p9, %p1204_p6 }
  0x37   :  { %1214 = shalt.err (!%p1211_p10)
}
  0x38   :  { %63 = dma.hbm_to_vmem [thread:$0]  %s1470_s3, 2048, %s58_s20, [#allocation6], %s1309_s18, %s1309_s18, %s1310_s19  }
  0x39   :  { %s1223_s0 = scalar_lea.vmem %s86_s22, 2048  ;;  %p1228_p12 = scmp.lt.s32.totalorder %s86_s22, %s86_s22 }
  0x3a   :  { %p1224_p11 = scmp.ne.s32.totalorder %s86_s22, %s1223_s0  ;;  %p1229_p13 = scmp.lt.s32.totalorder %s1223_s0, %s1223_s0 }
  0x3c   :  { %p1230_p0 = por %p1229_p13, %p1228_p12 }
  0x3e   :  { %p1231_p1 = pnand %p1230_p0, %p1224_p11 }
  0x40   :  { %1234 = shalt.err (!%p1231_p1)
}
  0x41   :  { %91 = dma.hbm_to_vmem [thread:$0]  %s1474_s7, 2048, %s86_s22, [#allocation9], %s1309_s18, %s1309_s18, %s1310_s19  }
  0x42   :  { %s1315_s27 = smov [#allocation13]  }
  0x43   :  { %s113_s28 = sshll.u32 %s1315_s27, 4  ;;  %s114_s28 = int_to_ptr.vmem [resolvable:$true] %s113_s28 }
  0x44   :  { %s1243_s1 = scalar_lea.vmem %s114_s28, 2048  ;;  %p1248_p3 = scmp.lt.s32.totalorder %s114_s28, %s114_s28 }
  0x45   :  { %p1244_p2 = scmp.ne.s32.totalorder %s114_s28, %s1243_s1  ;;  %p1249_p4 = scmp.lt.s32.totalorder %s1243_s1, %s1243_s1 }
  0x47   :  { %p1250_p5 = por %p1249_p4, %p1248_p3 }
  0x49   :  { %p1251_p6 = pnand %p1250_p5, %p1244_p2 }
  0x4b   :  { %1254 = shalt.err (!%p1251_p6)
}
  0x4c   :  { %119 = dma.hbm_to_vmem [thread:$0]  %s1478_s11, 2048, %s114_s28, [#allocation12], %s1309_s18, %s1309_s18, %s1310_s19  }
  0x4d   :  { %1295 = dma.done.wait [#allocation3], 256  }
  0x4e   :  { %1296 = vsyncadd [#allocation3], 4294967040 }
  0x4f   :  { %1297 = dma.done.wait [#allocation6], 2304  }
  0x50   :  { %1298 = vsyncadd [#allocation6], 4294964992 }
  0x51   :  { %1299 = dma.done.wait [#allocation9], 4096  }
  0x52   :  { %1300 = vsyncadd [#allocation9], 4294963200 }
  0x53   :  { %1301 = dma.done.wait [#allocation12], 4096  }
  0x54   :  { %1302 = vsyncadd [#allocation12], 4294963200  ;;  %vm154_vm0 = vcmask 130048   ;;  %v146_v0 = vld [vmem:[#allocation5 + $0x8] sm:$0xff]  ;;  %v145_v1 = vld [vmem:[#allocation5] sm:$0xff]  ;;  %s1316_s17 = smov [#allocation14]  }
  0x55   :  { %v143_v2 = vld [vmem:[#allocation2] sm:$0xff]  ;;  %910 = vmatprep.subr.mxu0 %v146_v0  ;;  %v263_v3 = vld [vmem:[#allocation7 + $0x78] sm:$0xff]  ;;  %v262_v4 = vld [vmem:[#allocation7 + $0x70] sm:$0xff]  ;;  %s771_s20 = sshll.u32 %s1316_s17, 4  ;;  %s772_s20 = int_to_ptr.vmem [resolvable:$true] %s771_s20 }
  0x56   :  { %914 = vmatprep.mubr.msk.f32.mxu0 %vm154_vm0, %v143_v2  ;;  %911 = vmatpush3.msra.mxu0 %v146_v0  ;;  %v144_v5 = vld [vmem:[#allocation2 + $0x8] sm:$0xff]  ;;  %v260_v7 = vld [vmem:[#allocation7 + $0x60] sm:$0xff]  ;;  %v259_v8 = vld [vmem:[#allocation7 + $0x58] sm:$0xff]  ;;  %s1255_s21 = scalar_lea.vmem %s772_s20, 256  ;;  %p1260_p8 = scmp.lt.s32.totalorder %s772_s20, %s772_s20 }
  0x57   :  { %917 = vmatprep.subr.mxu1 %v263_v3  ;;  %912 = vmatprep.subr.mxu0 %v145_v1  ;;  %v261_v6 = vld [vmem:[#allocation7 + $0x68] sm:$0xff]  ;;  %v258_v9 = vld [vmem:[#allocation7 + $0x50] sm:$0xff]  ;;  %v256_v11 = vld [vmem:[#allocation7 + $0x40] sm:$0xff]  ;;  %p1256_p7 = scmp.ne.s32.totalorder %s772_s20, %s1255_s21  ;;  %p1261_p9 = scmp.lt.s32.totalorder %s1255_s21, %s1255_s21 }
  0x58   :  { %918 = vmatpush3.msra.mxu1 %v263_v3  ;;  %913 = vmatpush3.msra.mxu0 %v145_v1  ;;  %v257_v10 = vld [vmem:[#allocation7 + $0x48] sm:$0xff]  ;;  %v255_v12 = vld [vmem:[#allocation7 + $0x38] sm:$0xff]  ;;  %v254_v13 = vld [vmem:[#allocation7 + $0x30] sm:$0xff] }
  0x59   :  { %919 = vmatprep.subr.mxu1 %v262_v4  ;;  %915 = vmatmul.mubr.msk.f32.vlgmr.msra.gmra.mxu0 %vm154_vm0, %v144_v5  ;;  %v253_v14 = vld [vmem:[#allocation7 + $0x28] sm:$0xff]  ;;  %v252_v15 = vld [vmem:[#allocation7 + $0x20] sm:$0xff]  ;;  %v251_v16 = vld [vmem:[#allocation7 + $0x18] sm:$0xff]  ;;  %p1262_p10 = por %p1261_p9, %p1260_p8 }
  0x5a   :  { %920 = vmatpush3.msra.mxu1 %v262_v4  ;;  %v250_v17 = vld [vmem:[#allocation7 + $0x10] sm:$0xff]  ;;  %v249_v18 = vld [vmem:[#allocation7 + $0x8] sm:$0xff]  ;;  %v248_v19 = vld [vmem:[#allocation7] sm:$0xff] }
  0x5b   :  { %921 = vmatprep.subr.mxu1 %v261_v6  ;;  %v373_v20 = vld [vmem:[#allocation8 + $0x78] sm:$0xff]  ;;  %v372_v21 = vld [vmem:[#allocation8 + $0x70] sm:$0xff]  ;;  %v371_v22 = vld [vmem:[#allocation8 + $0x68] sm:$0xff]  ;;  %p1263_p11 = pnand %p1262_p10, %p1256_p7 }
  0x5c   :  { %922 = vmatpush3.msra.mxu1 %v261_v6  ;;  %952 = vmatprep.subr.mxu0 %v373_v20  ;;  %v802_v23 = vld [vmem:[%s1469_s2] ss:$0 sm:$0xff]  ;;  %v369_v39 = vld [vmem:[#allocation8 + $0x58] sm:$0xff]  ;;  %v368_v40 = vld [vmem:[#allocation8 + $0x50] sm:$0xff] }
  0x5d   :  { %923 = vmatprep.subr.mxu1 %v260_v7  ;;  %953 = vmatpush3.msra.mxu0 %v373_v20  ;;  %v370_v38 = vld [vmem:[#allocation8 + $0x60] sm:$0xff]  ;;  %v367_v41 = vld [vmem:[#allocation8 + $0x48] sm:$0xff]  ;;  %v365_v43 = vld [vmem:[#allocation8 + $0x38] sm:$0xff] }
  0x5e   :  { %924 = vmatpush3.msra.mxu1 %v260_v7  ;;  %954 = vmatprep.subr.mxu0 %v372_v21  ;;  %v366_v42 = vld [vmem:[#allocation8 + $0x40] sm:$0xff]  ;;  %v364_v44 = vld [vmem:[#allocation8 + $0x30] sm:$0xff]  ;;  %v363_v45 = vld [vmem:[#allocation8 + $0x28] sm:$0xff] }
  0x5f   :  { %925 = vmatprep.subr.mxu1 %v259_v8  ;;  %955 = vmatpush3.msra.mxu0 %v372_v21  ;;  %v362_v46 = vld [vmem:[#allocation8 + $0x20] sm:$0xff]  ;;  %v361_v47 = vld [vmem:[#allocation8 + $0x18] sm:$0xff]  ;;  %v360_v48 = vld [vmem:[#allocation8 + $0x10] sm:$0xff] }
  0x60   :  { %926 = vmatpush3.msra.mxu1 %v259_v8  ;;  %956 = vmatprep.subr.mxu0 %v371_v22  ;;  %v359_v49 = vld [vmem:[#allocation8 + $0x8] sm:$0xff]  ;;  %v358_v50 = vld [vmem:[#allocation8] sm:$0xff]  ;;  %v483_v51 = vld [vmem:[#allocation10 + $0x78] sm:$0xff] }
  0x61   :  { %927 = vmatprep.subr.mxu1 %v258_v9  ;;  %957 = vmatpush3.msra.mxu0 %v371_v22  ;;  %v482_v52 = vld [vmem:[#allocation10 + $0x70] sm:$0xff]  ;;  %v481_v53 = vld [vmem:[#allocation10 + $0x68] sm:$0xff]  ;;  %v807_v54 = vld [vmem:[%s1471_s4] ss:$0 sm:$0xff] }
  0x62   :  { %928 = vmatpush3.msra.mxu1 %v258_v9  ;;  %958 = vmatprep.subr.mxu0 %v370_v38  ;;  %v480_v5 = vld [vmem:[#allocation10 + $0x60] sm:$0xff]  ;;  %v479_v6 = vld [vmem:[#allocation10 + $0x58] sm:$0xff]  ;;  %v478_v7 = vld [vmem:[#allocation10 + $0x50] sm:$0xff] }
  0x63   :  { %929 = vmatprep.subr.mxu1 %v257_v10  ;;  %959 = vmatpush3.msra.mxu0 %v370_v38  ;;  %v477_v8 = vld [vmem:[#allocation10 + $0x48] sm:$0xff]  ;;  %v476_v9 = vld [vmem:[#allocation10 + $0x40] sm:$0xff]  ;;  %v579_v22 = vld [vmem:[#allocation11 + $0x58] sm:$0xff] }
  0x64   :  { %930 = vmatpush3.msra.mxu1 %v257_v10  ;;  %960 = vmatprep.subr.mxu0 %v369_v39  ;;  %v475_v10 = vld [vmem:[#allocation10 + $0x38] sm:$0xff]  ;;  %v581_v20 = vld [vmem:[#allocation11 + $0x68] sm:$0xff]  ;;  %v580_v21 = vld [vmem:[#allocation11 + $0x60] sm:$0xff] }
  0x65   :  { %931 = vmatprep.subr.mxu1 %v256_v11  ;;  %961 = vmatpush3.msra.mxu0 %v369_v39 }
  0x66   :  { %932 = vmatpush3.msra.mxu1 %v256_v11  ;;  %962 = vmatprep.subr.mxu0 %v368_v40  ;;  %v474_v11 = vld [vmem:[#allocation10 + $0x30] sm:$0xff] }
  0x67   :  { %933 = vmatprep.subr.mxu1 %v255_v12  ;;  %963 = vmatpush3.msra.mxu0 %v368_v40 }
  0x68   :  { %934 = vmatpush3.msra.mxu1 %v255_v12  ;;  %964 = vmatprep.subr.mxu0 %v367_v41  ;;  %v473_v12 = vld [vmem:[#allocation10 + $0x28] sm:$0xff] }
  0x69   :  { %935 = vmatprep.subr.mxu1 %v254_v13  ;;  %965 = vmatpush3.msra.mxu0 %v367_v41 }
  0x6a   :  { %936 = vmatpush3.msra.mxu1 %v254_v13  ;;  %966 = vmatprep.subr.mxu0 %v366_v42  ;;  %v472_v13 = vld [vmem:[#allocation10 + $0x20] sm:$0xff] }
  0x6b   :  { %937 = vmatprep.subr.mxu1 %v253_v14  ;;  %967 = vmatpush3.msra.mxu0 %v366_v42 }
  0x6c   :  { %938 = vmatpush3.msra.mxu1 %v253_v14  ;;  %968 = vmatprep.subr.mxu0 %v365_v43  ;;  %v471_v14 = vld [vmem:[#allocation10 + $0x18] sm:$0xff] }
  0x6d   :  { %939 = vmatprep.subr.mxu1 %v252_v15  ;;  %969 = vmatpush3.msra.mxu0 %v365_v43 }
  0x6e   :  { %940 = vmatpush3.msra.mxu1 %v252_v15  ;;  %970 = vmatprep.subr.mxu0 %v364_v44  ;;  %v470_v15 = vld [vmem:[#allocation10 + $0x10] sm:$0xff] }
  0x6f   :  { %941 = vmatprep.subr.mxu1 %v251_v16  ;;  %971 = vmatpush3.msra.mxu0 %v364_v44 }
  0x70   :  { %942 = vmatpush3.msra.mxu1 %v251_v16  ;;  %972 = vmatprep.subr.mxu0 %v363_v45  ;;  %v469_v16 = vld [vmem:[#allocation10 + $0x8] sm:$0xff] }
  0x71   :  { %943 = vmatprep.subr.mxu1 %v250_v17  ;;  %973 = vmatpush3.msra.mxu0 %v363_v45 }
  0x72   :  { %944 = vmatpush3.msra.mxu1 %v250_v17  ;;  %974 = vmatprep.subr.mxu0 %v362_v46  ;;  %v468_v17 = vld [vmem:[#allocation10] sm:$0xff] }
  0x73   :  { %945 = vmatprep.subr.mxu1 %v249_v18  ;;  %975 = vmatpush3.msra.mxu0 %v362_v46  ;;  %v570_v46 = vld [vmem:[#allocation11 + $0x10] sm:$0xff] }
  0x74   :  { %946 = vmatpush3.msra.mxu1 %v249_v18  ;;  %976 = vmatprep.subr.mxu0 %v361_v47  ;;  %v583_v18 = vld [vmem:[#allocation11 + $0x78] sm:$0xff] }
  0x75   :  { %947 = vmatprep.subr.mxu1 %v248_v19  ;;  %977 = vmatpush3.msra.mxu0 %v361_v47  ;;  %v569_v47 = vld [vmem:[#allocation11 + $0x8] sm:$0xff] }
  0x76   :  { %948 = vmatpush3.msra.mxu1 %v248_v19  ;;  %978 = vmatprep.subr.mxu0 %v360_v48  ;;  %v582_v19 = vld [vmem:[#allocation11 + $0x70] sm:$0xff] }
  0x77   :  { %979 = vmatpush3.msra.mxu0 %v360_v48  ;;  %987 = vmatprep.subr.mxu1 %v483_v51  ;;  %v568_v48 = vld [vmem:[#allocation11] sm:$0xff] }
  0x78   :  { %980 = vmatprep.subr.mxu0 %v359_v49 }
  0x79   :  { %981 = vmatpush3.msra.mxu0 %v359_v49  ;;  %v681_v49 = vld [vmem:[#allocation13 + $0x78] sm:$0xff] }
  0x7a   :  { %982 = vmatprep.subr.mxu0 %v358_v50 }
  0x7b   :  { %983 = vmatpush3.msra.mxu0 %v358_v50  ;;  %v680_v50 = vld [vmem:[#allocation13 + $0x70] sm:$0xff] }
  0x7c   :  { %1022 = vmatprep.subr.mxu0 %v583_v18 }
 0x119   :  { %v916_v24 = vpop.f32.mrf.mxu0 }
 0x11a   :  { %v233_v25 = vadd.f32 %v916_v24, %v802_v23  ;;  %v577_v24 = vld [vmem:[#allocation11 + $0x48] sm:$0xff] }
 0x11b   :  { %v227_v26 = vpop.f32.mrf.mxu0 }
 0x11c   :  { %v239_v27 = vmin.f32 %v233_v25, 0.0  ;;  %v228_v28 = vadd.f32 %v802_v23, %v227_v26  ;;  %vm237_vm2 = vcmp.gt.f32.partialorder %v233_v25, 0.0  ;;  %v578_v23 = vld [vmem:[#allocation11 + $0x50] sm:$0xff]  ;;  %v575_v26 = vld [vmem:[#allocation11 + $0x38] sm:$0xff] }
 0x11e   :  { %v242_v29 = vmul.f32 1.442695, %v239_v27  ;;  %v238_v30 = vmin.f32 %v228_v28, 0.0  ;;  %vm236_vm1 = vcmp.gt.f32.partialorder %v228_v28, 0.0  ;;  %v574_v27 = vld [vmem:[#allocation11 + $0x30] sm:$0xff] }
 0x120   :  { %1103 = vpow2.f32 %v242_v29  ;;  %v240_v31 = vmul.f32 1.442695, %v238_v30  ;;  %v572_v29 = vld [vmem:[#allocation11 + $0x20] sm:$0xff]  ;;  %v571_v30 = vld [vmem:[#allocation11 + $0x18] sm:$0xff] }
 0x122   :  { %1105 = vpow2.f32 %v240_v31  ;;  %v810_v31 = vld [vmem:[%s1473_s6] ss:$0 sm:$0xff] }
 0x12d   :  { %v1104_v32 = vpop.eup %1103 }
 0x12e   :  { %v806_v34 = vadd.f32 -1.0, %v1104_v32 }
 0x12f   :  { %v1106_v33 = vpop.eup %1105 }
 0x130   :  { %v805_v35 = vadd.f32 -1.0, %v1106_v33  ;;  %v247_v37 = vsel %vm237_vm2, %v233_v25, %v806_v34  ;;  %v576_v25 = vld [vmem:[#allocation11 + $0x40] sm:$0xff] }
 0x132   :  { %v246_v36 = vsel %vm236_vm1, %v228_v28, %v805_v35  ;;  %v573_v28 = vld [vmem:[#allocation11 + $0x28] sm:$0xff] }
 0x133   :  { %949 = vmatprep.mubr.f32.mxu1 %v246_v36 }
 0x134   :  { %950 = vmatmul.mubr.f32.vlgmr.msra.gmra.mxu1 %v247_v37 }
 0x135   :  { %988 = vmatpush3.msra.mxu1 %v483_v51  ;;  %v679_v51 = vld [vmem:[#allocation13 + $0x68] sm:$0xff] }
 0x136   :  { %989 = vmatprep.subr.mxu1 %v482_v52 }
 0x137   :  { %990 = vmatpush3.msra.mxu1 %v482_v52  ;;  %v678_v52 = vld [vmem:[#allocation13 + $0x60] sm:$0xff] }
 0x138   :  { %991 = vmatprep.subr.mxu1 %v481_v53 }
 0x139   :  { %992 = vmatpush3.msra.mxu1 %v481_v53  ;;  %v677_v53 = vld [vmem:[#allocation13 + $0x58] sm:$0xff] }
 0x13a   :  { %993 = vmatprep.subr.mxu1 %v480_v5 }
 0x13b   :  { %994 = vmatpush3.msra.mxu1 %v480_v5  ;;  %v666_v5 = vld [vmem:[#allocation13] sm:$0xff] }
 0x13c   :  { %995 = vmatprep.subr.mxu1 %v479_v6 }
 0x13d   :  { %996 = vmatpush3.msra.mxu1 %v479_v6 }
 0x13e   :  { %997 = vmatprep.subr.mxu1 %v478_v7 }
 0x13f   :  { %998 = vmatpush3.msra.mxu1 %v478_v7  ;;  %v814_v7 = vld [vmem:[%s1477_s10] ss:$0 sm:$0xff] }
 0x140   :  { %999 = vmatprep.subr.mxu1 %v477_v8 }
 0x141   :  { %1000 = vmatpush3.msra.mxu1 %v477_v8 }
 0x142   :  { %1001 = vmatprep.subr.mxu1 %v476_v9 }
 0x143   :  { %1002 = vmatpush3.msra.mxu1 %v476_v9 }
 0x144   :  { %1003 = vmatprep.subr.mxu1 %v475_v10 }
 0x145   :  { %1004 = vmatpush3.msra.mxu1 %v475_v10 }
 0x146   :  { %1005 = vmatprep.subr.mxu1 %v474_v11 }
 0x147   :  { %1006 = vmatpush3.msra.mxu1 %v474_v11 }
 0x148   :  { %1007 = vmatprep.subr.mxu1 %v473_v12 }
 0x149   :  { %1008 = vmatpush3.msra.mxu1 %v473_v12 }
 0x14a   :  { %1009 = vmatprep.subr.mxu1 %v472_v13 }
 0x14b   :  { %1010 = vmatpush3.msra.mxu1 %v472_v13 }
 0x14c   :  { %1011 = vmatprep.subr.mxu1 %v471_v14 }
 0x14d   :  { %1012 = vmatpush3.msra.mxu1 %v471_v14 }
 0x14e   :  { %1013 = vmatprep.subr.mxu1 %v470_v15 }
 0x14f   :  { %1014 = vmatpush3.msra.mxu1 %v470_v15 }
 0x150   :  { %1015 = vmatprep.subr.mxu1 %v469_v16 }
 0x151   :  { %1016 = vmatpush3.msra.mxu1 %v469_v16 }
 0x152   :  { %1017 = vmatprep.subr.mxu1 %v468_v17 }
 0x153   :  { %1018 = vmatpush3.msra.mxu1 %v468_v17 }
 0x154   :  { %1057 = vmatprep.subr.mxu1 %v681_v49 }
 0x1f4   :  { %v951_v55 = vpop.f32.mrf.mxu1 }
 0x1f5   :  { %v343_v56 = vadd.f32 %v951_v55, %v807_v54  ;;  %v675_v55 = vld [vmem:[#allocation13 + $0x48] sm:$0xff] }
 0x1f6   :  { %v337_v57 = vpop.f32.mrf.mxu1 }
 0x1f7   :  { %v349_v58 = vmin.f32 %v343_v56, 0.0  ;;  %v338_v59 = vadd.f32 %v807_v54, %v337_v57  ;;  %vm347_vm4 = vcmp.gt.f32.partialorder %v343_v56, 0.0  ;;  %v676_v54 = vld [vmem:[#allocation13 + $0x50] sm:$0xff]  ;;  %v673_v57 = vld [vmem:[#allocation13 + $0x38] sm:$0xff] }
 0x1f9   :  { %v352_v60 = vmul.f32 1.442695, %v349_v58  ;;  %v348_v61 = vmin.f32 %v338_v59, 0.0  ;;  %vm346_vm3 = vcmp.gt.f32.partialorder %v338_v59, 0.0  ;;  %v672_v58 = vld [vmem:[#allocation13 + $0x30] sm:$0xff] }
 0x1fb   :  { %1107 = vpow2.f32 %v352_v60  ;;  %v350_v62 = vmul.f32 1.442695, %v348_v61  ;;  %v670_v60 = vld [vmem:[#allocation13 + $0x20] sm:$0xff]  ;;  %v669_v61 = vld [vmem:[#allocation13 + $0x18] sm:$0xff] }
 0x1fd   :  { %1109 = vpow2.f32 %v350_v62  ;;  %v813_v62 = vld [vmem:[%s1475_s8] ss:$0 sm:$0xff] }
 0x208   :  { %v1108_v63 = vpop.eup %1107 }
 0x209   :  { %v809_v1 = vadd.f32 -1.0, %v1108_v63 }
 0x20a   :  { %v1110_v0 = vpop.eup %1109 }
 0x20b   :  { %v808_v2 = vadd.f32 -1.0, %v1110_v0  ;;  %v357_v4 = vsel %vm347_vm4, %v343_v56, %v809_v1  ;;  %v674_v56 = vld [vmem:[#allocation13 + $0x40] sm:$0xff] }
 0x20d   :  { %v356_v3 = vsel %vm346_vm3, %v338_v59, %v808_v2  ;;  %v671_v59 = vld [vmem:[#allocation13 + $0x28] sm:$0xff] }
 0x20e   :  { %984 = vmatprep.mubr.f32.mxu0 %v356_v3  ;;  %v668_v3 = vld [vmem:[#allocation13 + $0x10] sm:$0xff] }
 0x20f   :  { %985 = vmatmul.mubr.f32.vlgmr.msra.gmra.mxu0 %v357_v4  ;;  %v667_v4 = vld [vmem:[#allocation13 + $0x8] sm:$0xff] }
 0x210   :  { %1023 = vmatpush3.msra.mxu0 %v583_v18 }
 0x211   :  { %1024 = vmatprep.subr.mxu0 %v582_v19 }
 0x212   :  { %1025 = vmatpush3.msra.mxu0 %v582_v19 }
 0x213   :  { %1026 = vmatprep.subr.mxu0 %v581_v20 }
 0x214   :  { %1027 = vmatpush3.msra.mxu0 %v581_v20 }
 0x215   :  { %1028 = vmatprep.subr.mxu0 %v580_v21 }
 0x216   :  { %1029 = vmatpush3.msra.mxu0 %v580_v21 }
 0x217   :  { %1030 = vmatprep.subr.mxu0 %v579_v22 }
 0x218   :  { %1031 = vmatpush3.msra.mxu0 %v579_v22 }
 0x219   :  { %1032 = vmatprep.subr.mxu0 %v578_v23 }
 0x21a   :  { %1033 = vmatpush3.msra.mxu0 %v578_v23 }
 0x21b   :  { %1034 = vmatprep.subr.mxu0 %v577_v24 }
 0x21c   :  { %1035 = vmatpush3.msra.mxu0 %v577_v24 }
 0x21d   :  { %1036 = vmatprep.subr.mxu0 %v576_v25 }
 0x21e   :  { %1037 = vmatpush3.msra.mxu0 %v576_v25 }
 0x21f   :  { %1038 = vmatprep.subr.mxu0 %v575_v26 }
 0x220   :  { %1039 = vmatpush3.msra.mxu0 %v575_v26 }
 0x221   :  { %1040 = vmatprep.subr.mxu0 %v574_v27 }
 0x222   :  { %1041 = vmatpush3.msra.mxu0 %v574_v27 }
 0x223   :  { %1042 = vmatprep.subr.mxu0 %v573_v28 }
 0x224   :  { %1043 = vmatpush3.msra.mxu0 %v573_v28 }
 0x225   :  { %1044 = vmatprep.subr.mxu0 %v572_v29 }
 0x226   :  { %1045 = vmatpush3.msra.mxu0 %v572_v29 }
 0x227   :  { %1046 = vmatprep.subr.mxu0 %v571_v30 }
 0x228   :  { %1047 = vmatpush3.msra.mxu0 %v571_v30 }
 0x229   :  { %1048 = vmatprep.subr.mxu0 %v570_v46 }
 0x22a   :  { %1049 = vmatpush3.msra.mxu0 %v570_v46 }
 0x22b   :  { %1050 = vmatprep.subr.mxu0 %v569_v47 }
 0x22c   :  { %1051 = vmatpush3.msra.mxu0 %v569_v47 }
 0x22d   :  { %1052 = vmatprep.subr.mxu0 %v568_v48 }
 0x22e   :  { %1053 = vmatpush3.msra.mxu0 %v568_v48 }
 0x2cf   :  { %v986_v32 = vpop.f32.mrf.mxu0 }
 0x2d0   :  { %v453_v33 = vadd.f32 %v986_v32, %v810_v31 }
 0x2d1   :  { %v447_v34 = vpop.f32.mrf.mxu0 }
 0x2d2   :  { %v459_v35 = vmin.f32 %v453_v33, 0.0  ;;  %v448_v36 = vadd.f32 %v810_v31, %v447_v34  ;;  %vm457_vm6 = vcmp.gt.f32.partialorder %v453_v33, 0.0 }
 0x2d4   :  { %v462_v37 = vmul.f32 1.442695, %v459_v35  ;;  %v458_v38 = vmin.f32 %v448_v36, 0.0  ;;  %vm456_vm5 = vcmp.gt.f32.partialorder %v448_v36, 0.0 }
 0x2d6   :  { %1111 = vpow2.f32 %v462_v37  ;;  %v460_v39 = vmul.f32 1.442695, %v458_v38 }
 0x2d8   :  { %1113 = vpow2.f32 %v460_v39 }
 0x2e3   :  { %v1112_v40 = vpop.eup %1111 }
 0x2e4   :  { %v812_v42 = vadd.f32 -1.0, %v1112_v40 }
 0x2e5   :  { %v1114_v41 = vpop.eup %1113 }
 0x2e6   :  { %v811_v43 = vadd.f32 -1.0, %v1114_v41  ;;  %v467_v45 = vsel %vm457_vm6, %v453_v33, %v812_v42 }
 0x2e8   :  { %v466_v44 = vsel %vm456_vm5, %v448_v36, %v811_v43 }
 0x2e9   :  { %1019 = vmatprep.mubr.f32.mxu1 %v466_v44 }
 0x2ea   :  { %1020 = vmatmul.mubr.f32.vlgmr.msra.gmra.mxu1 %v467_v45 }
 0x2eb   :  { %1058 = vmatpush3.msra.mxu1 %v681_v49 }
 0x2ec   :  { %1059 = vmatprep.subr.mxu1 %v680_v50 }
 0x2ed   :  { %1060 = vmatpush3.msra.mxu1 %v680_v50 }
 0x2ee   :  { %1061 = vmatprep.subr.mxu1 %v679_v51 }
 0x2ef   :  { %1062 = vmatpush3.msra.mxu1 %v679_v51 }
 0x2f0   :  { %1063 = vmatprep.subr.mxu1 %v678_v52 }
 0x2f1   :  { %1064 = vmatpush3.msra.mxu1 %v678_v52 }
 0x2f2   :  { %1065 = vmatprep.subr.mxu1 %v677_v53 }
 0x2f3   :  { %1066 = vmatpush3.msra.mxu1 %v677_v53 }
 0x2f4   :  { %1067 = vmatprep.subr.mxu1 %v676_v54 }
 0x2f5   :  { %1068 = vmatpush3.msra.mxu1 %v676_v54 }
 0x2f6   :  { %1069 = vmatprep.subr.mxu1 %v675_v55 }
 0x2f7   :  { %1070 = vmatpush3.msra.mxu1 %v675_v55 }
 0x2f8   :  { %1071 = vmatprep.subr.mxu1 %v674_v56 }
 0x2f9   :  { %1072 = vmatpush3.msra.mxu1 %v674_v56 }
 0x2fa   :  { %1073 = vmatprep.subr.mxu1 %v673_v57 }
 0x2fb   :  { %1074 = vmatpush3.msra.mxu1 %v673_v57 }
 0x2fc   :  { %1075 = vmatprep.subr.mxu1 %v672_v58 }
 0x2fd   :  { %1076 = vmatpush3.msra.mxu1 %v672_v58 }
 0x2fe   :  { %1077 = vmatprep.subr.mxu1 %v671_v59 }
 0x2ff   :  { %1078 = vmatpush3.msra.mxu1 %v671_v59 }
 0x300   :  { %1079 = vmatprep.subr.mxu1 %v670_v60 }
 0x301   :  { %1080 = vmatpush3.msra.mxu1 %v670_v60 }
 0x302   :  { %1081 = vmatprep.subr.mxu1 %v669_v61 }
 0x303   :  { %1082 = vmatpush3.msra.mxu1 %v669_v61 }
 0x304   :  { %1083 = vmatprep.subr.mxu1 %v668_v3 }
 0x305   :  { %1084 = vmatpush3.msra.mxu1 %v668_v3 }
 0x306   :  { %1085 = vmatprep.subr.mxu1 %v667_v4 }
 0x307   :  { %1086 = vmatpush3.msra.mxu1 %v667_v4 }
 0x308   :  { %1087 = vmatprep.subr.mxu1 %v666_v5 }
 0x309   :  { %1088 = vmatpush3.msra.mxu1 %v666_v5 }
 0x3aa   :  { %v1021_v63 = vpop.f32.mrf.mxu1 }
 0x3ab   :  { %v563_v0 = vadd.f32 %v1021_v63, %v813_v62 }
 0x3ac   :  { %v557_v1 = vpop.f32.mrf.mxu1 }
 0x3ad   :  { %567 = vst [vmem:[#allocation14 + $0x8] sm:$0xff] %v563_v0  ;;  %v558_v2 = vadd.f32 %v813_v62, %v557_v1 }
 0x3af   :  { %566 = vst [vmem:[#allocation14] sm:$0xff] %v558_v2  ;;  %1054 = vmatprep.mubr.f32.mxu0 %v558_v2 }
 0x3b0   :  { %1055 = vmatmul.mubr.f32.vlgmr.msra.gmra.mxu0 %v563_v0 }
 0x470   :  { %v1056_v6 = vpop.f32.mrf.mxu0 }
 0x471   :  { %v663_v10 = vadd.f32 %v1056_v6, %v814_v7 }
 0x472   :  { %v657_v8 = vpop.f32.mrf.mxu0 }
 0x473   :  { %v658_v9 = vadd.f32 %v814_v7, %v657_v8 }
 0x475   :  { %1089 = vmatprep.mubr.f32.mxu1 %v658_v9 }
 0x476   :  { %1090 = vmatmul.mubr.f32.vlgmr.msra.gmra.mxu1 %v663_v10 }
 0x477   :  { %1266 = shalt.err (!%p1263_p11)
}
 0x478   :  { %777 = dma.vmem_to_hbm [thread:$0]  %s772_s20, 256, %s1480_s13, [#allocation4], %s1309_s18, %s1309_s18, %s1310_s19  }
 0x479   :  { %v815_v11 = vld [vmem:[%s1479_s12] ss:$0 sm:$0xff]  ;;  %s1317_s24 = smov [#allocation15]  }
 0x47a   :  { %s783_s0 = sshll.u32 %s1317_s24, 4  ;;  %s784_s0 = int_to_ptr.vmem [resolvable:$true] %s783_s0 }
 0x47b   :  { %s1275_s25 = scalar_lea.vmem %s784_s0, 256  ;;  %p1280_p13 = scmp.lt.s32.totalorder %s784_s0, %s784_s0 }
 0x47c   :  { %p1276_p12 = scmp.ne.s32.totalorder %s784_s0, %s1275_s25  ;;  %p1281_p0 = scmp.lt.s32.totalorder %s1275_s25, %s1275_s25 }
 0x47e   :  { %p1282_p1 = por %p1281_p0, %p1280_p13 }
 0x480   :  { %p1283_p2 = pnand %p1282_p1, %p1276_p12 }
 0x536   :  { %v1091_v12 = vpop.f32.mrf.mxu1 }
 0x537   :  { %v761_v13 = vadd.f32 %v1091_v12, %v815_v11 }
 0x538   :  { %v755_v14 = vpop.f32.mrf.mxu1 }
 0x539   :  { %765 = vst [vmem:[#allocation15 + $0x8] sm:$0xff] %v761_v13  ;;  %v756_v15 = vadd.f32 %v815_v11, %v755_v14 }
 0x53b   :  { %764 = vst [vmem:[#allocation15] sm:$0xff] %v756_v15 }
 0x53c   :  { %1286 = shalt.err (!%p1283_p2)
}
 0x53d   :  { %789 = dma.vmem_to_hbm [thread:$0]  %s784_s0, 256, %s1481_s14, [#allocation16], %s1309_s18, %s1309_s18, %s1310_s19  }
 0x53e   :  { %1303 = dma.done.wait [#allocation4], 256  }
 0x53f   :  { %1304 = vsyncadd [#allocation4], 4294967040 }
 0x540   :  { %1305 = dma.done.wait [#allocation16], 256  }
 0x541   :  { %1306 = vsyncadd [#allocation16], 4294967040 }
 0x542   :  { %796 = vsyncpa [#allocation3], 1 }
 0x543   :  { %797 = vsyncpa [#allocation6], 1 }
 0x544   :  { %798 = vsyncpa [#allocation9], 1 }
 0x545   :  { %799 = vsyncpa [#allocation12], 1 }
 0x546   :  { %800 = vsyncpa [#allocation4], 1 }
 0x547   :  { %801 = vsyncpa [#allocation16], 1 }

</bundles_post_ra>
